<compile_context>
chip_gen: v6e
topology: v6e:2x2x1
jax: 0.10.0
libtpu: 0.0.40
codegen_flags: <defaults>
</compile_context>

<pallas_src>
import jax
import jax.numpy as jnp
from jax.experimental import pallas as pl
from jax.experimental.pallas import tpu as pltpu


# ---------------------------------------------------------------------------
# Kernel 1: hoisted input->gates projection (one big matmul per gate).
# ---------------------------------------------------------------------------
def input_gates_kernel(x_ref, wr_ref, wz_ref, wn_ref, br_ref, bz_ref, bn_ref,
                       gr_ref, gz_ref, gn_ref):
    x = x_ref[...]                                                  # (bm, H) bf16
    gr = jnp.dot(x, wr_ref[...], preferred_element_type=jnp.float32) + br_ref[...]
    gz = jnp.dot(x, wz_ref[...], preferred_element_type=jnp.float32) + bz_ref[...]
    gn = jnp.dot(x, wn_ref[...], preferred_element_type=jnp.float32) + bn_ref[...]
    gr_ref[...] = gr.astype(gr_ref.dtype)
    gz_ref[...] = gz.astype(gz_ref.dtype)
    gn_ref[...] = gn.astype(gn_ref.dtype)


def _input_gates(emb_flat, w_r, w_z, w_n, b_r, b_z, b_n, *, block_m):
    TB, H = emb_flat.shape
    row = lambda i: (i, 0)
    full = lambda i: (0, 0)
    out_sds = jax.ShapeDtypeStruct((TB, H), jnp.bfloat16)
    return pl.pallas_call(
        input_gates_kernel,
        out_shape=(out_sds, out_sds, out_sds),
        grid=(TB // block_m,),
        in_specs=[
            pl.BlockSpec((block_m, H), row),   # emb (flattened time-major)
            pl.BlockSpec((H, H), full),        # W_ir^T
            pl.BlockSpec((H, H), full),        # W_iz^T
            pl.BlockSpec((H, H), full),        # W_in^T
            pl.BlockSpec((1, H), full),        # b_ir + b_hr
            pl.BlockSpec((1, H), full),        # b_iz + b_hz
            pl.BlockSpec((1, H), full),        # b_in
        ],
        out_specs=(pl.BlockSpec((block_m, H), row),) * 3,
        compiler_params=pltpu.CompilerParams(dimension_semantics=("parallel",)),
    )(emb_flat, w_r, w_z, w_n, b_r, b_z, b_n)


# ---------------------------------------------------------------------------
# Kernel 2: sequential GRU recurrence, streamed over T (grid axis).
# ---------------------------------------------------------------------------
def gru_recurrence_kernel(len_ref, gir_ref, giz_ref, gin_ref,
                          whr_ref, whz_ref, whn_ref, bhn_ref, h_ref):
    t = pl.program_id(0)

    @pl.when(t == 0)
    def _():
        h_ref[...] = jnp.zeros_like(h_ref)

    h_prev = h_ref[...]                                             # (B, H) f32
    h_bf = h_prev.astype(jnp.bfloat16)                              # MXU operand

    gh_r = jnp.dot(h_bf, whr_ref[...], preferred_element_type=jnp.float32)
    gh_z = jnp.dot(h_bf, whz_ref[...], preferred_element_type=jnp.float32)
    gh_n = jnp.dot(h_bf, whn_ref[...], preferred_element_type=jnp.float32) + bhn_ref[...]

    # Gate math in f32 (input gates were precomputed with biases folded in).
    r = jax.nn.sigmoid(gir_ref[0].astype(jnp.float32) + gh_r)
    z = jax.nn.sigmoid(giz_ref[0].astype(jnp.float32) + gh_z)
    n = jnp.tanh(gin_ref[0].astype(jnp.float32) + r * gh_n)
    h_new = (1.0 - z) * n + z * h_prev

    # pack_padded_sequence semantics: freeze h once t >= len_states[b].
    h_ref[...] = jnp.where(t < len_ref[...], h_new, h_prev)


def _gru_recurrence(len_b1, gi_r, gi_z, gi_n, w_hr, w_hz, w_hn, b_hn):
    T, B, H = gi_r.shape
    step = lambda t: (t, 0, 0)
    keep = lambda t: (0, 0)
    return pl.pallas_call(
        gru_recurrence_kernel,
        out_shape=jax.ShapeDtypeStruct((B, H), jnp.float32),
        grid=(T,),
        in_specs=[
            pl.BlockSpec((B, 1), keep),        # len_states (int32), resident
            pl.BlockSpec((1, B, H), step),     # gi_r (streamed, double-buffered)
            pl.BlockSpec((1, B, H), step),     # gi_z
            pl.BlockSpec((1, B, H), step),     # gi_n
            pl.BlockSpec((H, H), keep),        # W_hr^T (resident)
            pl.BlockSpec((H, H), keep),        # W_hz^T
            pl.BlockSpec((H, H), keep),        # W_hn^T
            pl.BlockSpec((1, H), keep),        # b_hn
        ],
        out_specs=pl.BlockSpec((B, H), keep),  # resident hidden-state accumulator
        compiler_params=pltpu.CompilerParams(dimension_semantics=("arbitrary",)),
    )(len_b1, gi_r, gi_z, gi_n, w_hr, w_hz, w_hn, b_hn)


# ---------------------------------------------------------------------------
# Kernel 3: final item projection, tiled over a lane-aligned item axis.
# ---------------------------------------------------------------------------
def fc_kernel(h_ref, w_ref, b_ref, out_ref):
    out = jnp.dot(h_ref[...], w_ref[...], preferred_element_type=jnp.float32) + b_ref[...]
    out_ref[...] = out.astype(out_ref.dtype)


def _fc(h_bf, w_pad, b_pad, *, block_n):
    B, H = h_bf.shape
    _, Ipad = w_pad.shape
    return pl.pallas_call(
        fc_kernel,
        out_shape=jax.ShapeDtypeStruct((B, Ipad), jnp.float32),
        grid=(Ipad // block_n,),
        in_specs=[
            pl.BlockSpec((B, H), lambda j: (0, 0)),
            pl.BlockSpec((H, block_n), lambda j: (0, j)),
            pl.BlockSpec((1, block_n), lambda j: (0, j)),
        ],
        out_specs=pl.BlockSpec((B, block_n), lambda j: (0, j)),
        compiler_params=pltpu.CompilerParams(dimension_semantics=("parallel",)),
    )(h_bf, w_pad, b_pad)


def _pick_block(n, candidates=(512, 256, 128, 64, 32, 16, 8)):
    for c in candidates:
        if n % c == 0:
            return c
    return n   # fall back to the full extent (always legal)


# ---------------------------------------------------------------------------
# Full forward: embedding gather -> hoisted gates -> recurrence -> projection
# ---------------------------------------------------------------------------
def gru_forward(states, len_states, params):
    """states: (B, T) int32, len_states: (B,) int32."""
    B, T = states.shape
    H = params["item_emb"].shape[1]
    I = params["w_fc"].shape[0]
    compute = jnp.bfloat16   # MXU operand dtype; accumulation & gate math stay f32

    w_ih, w_hh = params["w_ih"], params["w_hh"]          # torch layout (3H, H), gates r,z,n
    b_ih, b_hh = params["b_ih"], params["b_hh"]

    # Split per gate and transpose so kernels compute x @ W (lane-aligned gate
    # boundaries: no sub-tile slicing inside the kernels).
    w_ir, w_iz, w_in = (w_ih[0:H].T.astype(compute),
                        w_ih[H:2 * H].T.astype(compute),
                        w_ih[2 * H:3 * H].T.astype(compute))
    w_hr, w_hz, w_hn = (w_hh[0:H].T.astype(compute),
                        w_hh[H:2 * H].T.astype(compute),
                        w_hh[2 * H:3 * H].T.astype(compute))

    # Fold biases: b_hr/b_hz can be absorbed into the precomputed input gates;
    # b_hn must stay separate (it is scaled by r inside the recurrence).
    b_r = (b_ih[0:H] + b_hh[0:H])[None, :].astype(jnp.float32)
    b_z = (b_ih[H:2 * H] + b_hh[H:2 * H])[None, :].astype(jnp.float32)
    b_n_i = b_ih[2 * H:3 * H][None, :].astype(jnp.float32)
    b_n_h = b_hh[2 * H:3 * H][None, :].astype(jnp.float32)

    # Embedding gather (wrapper-side).
    # TODO(synk): could be fused into the gates kernel with scalar-prefetched
    # `states` + per-row DMA gather to avoid materializing (B,T,H) in HBM.
    emb = params["item_emb"][states]                      # (B, T, H) f32
    emb_tm = jnp.transpose(emb, (1, 0, 2))                # (T, B, H) time-major
    emb_flat = emb_tm.reshape(T * B, H).astype(compute)   # (T*B, H) bf16

    # Phase 1: one big MXU matmul per gate, off the serial critical path.
    bm = _pick_block(T * B)
    gi_r, gi_z, gi_n = _input_gates(emb_flat, w_ir, w_iz, w_in,
                                    b_r, b_z, b_n_i, block_m=bm)
    gi_r = gi_r.reshape(T, B, H)
    gi_z = gi_z.reshape(T, B, H)
    gi_n = gi_n.reshape(T, B, H)

    # Phase 2: sequential recurrence, streamed over T (no (T,B,H) mask tensor).
    len_b1 = len_states.astype(jnp.int32).reshape(B, 1)
    h_final = _gru_recurrence(len_b1, gi_r, gi_z, gi_n, w_hr, w_hz, w_hn, b_n_h)

    # Phase 3: item projection, tiled over an item axis padded to 128 lanes.
    I_pad = ((I + 127) // 128) * 128
    w_fc = jnp.pad(params["w_fc"].T.astype(compute), ((0, 0), (0, I_pad - I)))
    b_fc = jnp.pad(params["b_fc"], (0, I_pad - I))[None, :].astype(jnp.float32)
    bn = 256 if I_pad % 256 == 0 else 128
    logits = _fc(h_final.astype(compute), w_fc, b_fc, block_n=bn)
    return logits[:, :I]


# ---------------------------------------------------------------------------
# Pure-JAX f32 reference (mirrors PyTorch packed-GRU + Linear) and init.
# ---------------------------------------------------------------------------
def reference_forward(states, len_states, params):
    B, T = states.shape
    H = params["item_emb"].shape[1]
    emb = params["item_emb"][states]                      # (B, T, H)
    h = jnp.zeros((B, H), jnp.float32)
    for t in range(T):
        x_t = emb[:, t, :]
        gi = x_t @ params["w_ih"].T + params["b_ih"]
        gh = h @ params["w_hh"].T + params["b_hh"]
        i_r, i_z, i_n = gi[:, :H], gi[:, H:2 * H], gi[:, 2 * H:]
        h_r, h_z, h_n = gh[:, :H], gh[:, H:2 * H], gh[:, 2 * H:]
        r = jax.nn.sigmoid(i_r + h_r)
        z = jax.nn.sigmoid(i_z + h_z)
        n = jnp.tanh(i_n + r * h_n)
        h_new = (1.0 - z) * n + z * h
        m = (t < len_states).astype(jnp.float32)[:, None]
        h = m * h_new + (1.0 - m) * h
    return h @ params["w_fc"].T + params["b_fc"]


def init_params(key, hidden_size, item_num):
    ks = jax.random.split(key, 7)
    H = hidden_size
    k = 1.0 / jnp.sqrt(H)
    return {
        # nn.init.normal_(weight, 0, 0.01)
        "item_emb": 0.01 * jax.random.normal(ks[0], (item_num + 1, H), jnp.float32),
        # nn.GRU default init: U(-1/sqrt(H), 1/sqrt(H)), gate order (r, z, n)
        "w_ih": jax.random.uniform(ks[1], (3 * H, H), jnp.float32, -k, k),
        "w_hh": jax.random.uniform(ks[2], (3 * H, H), jnp.float32, -k, k),
        "b_ih": jax.random.uniform(ks[3], (3 * H,), jnp.float32, -k, k),
        "b_hh": jax.random.uniform(ks[4], (3 * H,), jnp.float32, -k, k),
        # nn.Linear(H, item_num)
        "w_fc": jax.random.uniform(ks[5], (item_num, H), jnp.float32, -k, k),
        "b_fc": jax.random.uniform(ks[6], (item_num,), jnp.float32, -k, k),
    }


if __name__ == "__main__":
    hidden_size = 32
    item_num = 50
    state_size = 8   # T
    batch = 2

    key = jax.random.PRNGKey(0)
    kp, ks = jax.random.split(key)
    params = init_params(kp, hidden_size, item_num)

    states = jax.random.randint(ks, (batch, state_size), 0, item_num + 1, dtype=jnp.int32)
    len_states = jnp.array([state_size, 5], dtype=jnp.int32)

    out = gru_forward(states, len_states, params)
    out = jax.block_until_ready(out)

    ref = reference_forward(states, len_states, params)
    assert out.shape == (batch, item_num)
    # Tolerance accounts for bf16 MXU operands (f32 accumulation + f32 gate math).
    assert jnp.allclose(out, ref, atol=2e-2, rtol=2e-2), "mismatch vs JAX reference"

    print("KERNEL_OK")
</pallas_src>

<mosaic_0001>
module attributes {stable_mosaic.version = 11 : i64} {
  func.func @input_gates_kernel(%arg0: i32, %arg1: memref<16x32xbf16, #tpu.memory_space<vmem>>, %arg2: memref<32x32xbf16, #tpu.memory_space<vmem>>, %arg3: memref<32x32xbf16, #tpu.memory_space<vmem>>, %arg4: memref<32x32xbf16, #tpu.memory_space<vmem>>, %arg5: memref<1x32xf32, #tpu.memory_space<vmem>>, %arg6: memref<1x32xf32, #tpu.memory_space<vmem>>, %arg7: memref<1x32xf32, #tpu.memory_space<vmem>>, %arg8: memref<16x32xbf16, #tpu.memory_space<vmem>>, %arg9: memref<16x32xbf16, #tpu.memory_space<vmem>>, %arg10: memref<16x32xbf16, #tpu.memory_space<vmem>>) attributes {dimension_semantics = [#tpu.dimension_semantics<parallel>], iteration_bounds = array<i64: 1>, scalar_prefetch = 0 : i64, scratch_operands = 0 : i64, tpu.core_type = #tpu.core_type<tc>, window_params = [{transform_indices = @transform_0, window_bounds = array<i64: 16, 32>}, {pipeline_mode = #tpu.pipeline_mode<synchronous>, transform_indices = @transform_1, window_bounds = array<i64: 32, 32>}, {pipeline_mode = #tpu.pipeline_mode<synchronous>, transform_indices = @transform_2, window_bounds = array<i64: 32, 32>}, {pipeline_mode = #tpu.pipeline_mode<synchronous>, transform_indices = @transform_3, window_bounds = array<i64: 32, 32>}, {pipeline_mode = #tpu.pipeline_mode<synchronous>, transform_indices = @transform_4, window_bounds = array<i64: 1, 32>}, {pipeline_mode = #tpu.pipeline_mode<synchronous>, transform_indices = @transform_5, window_bounds = array<i64: 1, 32>}, {pipeline_mode = #tpu.pipeline_mode<synchronous>, transform_indices = @transform_6, window_bounds = array<i64: 1, 32>}, {transform_indices = @transform_7, window_bounds = array<i64: 16, 32>}, {transform_indices = @transform_8, window_bounds = array<i64: 16, 32>}, {transform_indices = @transform_9, window_bounds = array<i64: 16, 32>}]} {
    %c0 = arith.constant 0 : index
    %c0_0 = arith.constant 0 : index
    %0 = vector.load %arg1[%c0, %c0_0] : memref<16x32xbf16, #tpu.memory_space<vmem>>, vector<16x32xbf16>
    %c0_1 = arith.constant 0 : index
    %c0_2 = arith.constant 0 : index
    %1 = vector.load %arg2[%c0_1, %c0_2] : memref<32x32xbf16, #tpu.memory_space<vmem>>, vector<32x32xbf16>
    %cst = arith.constant dense<0.000000e+00> : vector<16x32xf32>
    %2 = tpu.matmul %0, %1, %cst {dimension_numbers = #tpu.dot_dimension_numbers<[1], [0], [0], [1], [0, 0, 1, 1], [], []>} : vector<16x32xbf16>, vector<32x32xbf16>, vector<16x32xf32> -> vector<16x32xf32>
    %c0_3 = arith.constant 0 : index
    %c0_4 = arith.constant 0 : index
    %3 = vector.load %arg5[%c0_3, %c0_4] : memref<1x32xf32, #tpu.memory_space<vmem>>, vector<1x32xf32>
    %4 = vector.broadcast %3 : vector<1x32xf32> to vector<16x32xf32>
    %5 = arith.addf %2, %4 : vector<16x32xf32>
    %c0_5 = arith.constant 0 : index
    %c0_6 = arith.constant 0 : index
    %6 = vector.load %arg3[%c0_5, %c0_6] : memref<32x32xbf16, #tpu.memory_space<vmem>>, vector<32x32xbf16>
    %cst_7 = arith.constant dense<0.000000e+00> : vector<16x32xf32>
    %7 = tpu.matmul %0, %6, %cst_7 {dimension_numbers = #tpu.dot_dimension_numbers<[1], [0], [0], [1], [0, 0, 1, 1], [], []>} : vector<16x32xbf16>, vector<32x32xbf16>, vector<16x32xf32> -> vector<16x32xf32>
    %c0_8 = arith.constant 0 : index
    %c0_9 = arith.constant 0 : index
    %8 = vector.load %arg6[%c0_8, %c0_9] : memref<1x32xf32, #tpu.memory_space<vmem>>, vector<1x32xf32>
    %9 = vector.broadcast %8 : vector<1x32xf32> to vector<16x32xf32>
    %10 = arith.addf %7, %9 : vector<16x32xf32>
    %c0_10 = arith.constant 0 : index
    %c0_11 = arith.constant 0 : index
    %11 = vector.load %arg4[%c0_10, %c0_11] : memref<32x32xbf16, #tpu.memory_space<vmem>>, vector<32x32xbf16>
    %cst_12 = arith.constant dense<0.000000e+00> : vector<16x32xf32>
    %12 = tpu.matmul %0, %11, %cst_12 {dimension_numbers = #tpu.dot_dimension_numbers<[1], [0], [0], [1], [0, 0, 1, 1], [], []>} : vector<16x32xbf16>, vector<32x32xbf16>, vector<16x32xf32> -> vector<16x32xf32>
    %c0_13 = arith.constant 0 : index
    %c0_14 = arith.constant 0 : index
    %13 = vector.load %arg7[%c0_13, %c0_14] : memref<1x32xf32, #tpu.memory_space<vmem>>, vector<1x32xf32>
    %14 = vector.broadcast %13 : vector<1x32xf32> to vector<16x32xf32>
    %15 = arith.addf %12, %14 : vector<16x32xf32>
    %16 = arith.truncf %5 : vector<16x32xf32> to vector<16x32xbf16>
    %c0_15 = arith.constant 0 : index
    %c0_16 = arith.constant 0 : index
    %17 = vector.load %arg8[%c0_15, %c0_16] : memref<16x32xbf16, #tpu.memory_space<vmem>>, vector<16x32xbf16>
    tpu.vector_store %arg8[%c0_15, %c0_16], %16 {strides = array<i32>} : memref<16x32xbf16, #tpu.memory_space<vmem>>, vector<16x32xbf16>,
    %18 = arith.truncf %10 : vector<16x32xf32> to vector<16x32xbf16>
    %c0_17 = arith.constant 0 : index
    %c0_18 = arith.constant 0 : index
    %19 = vector.load %arg9[%c0_17, %c0_18] : memref<16x32xbf16, #tpu.memory_space<vmem>>, vector<16x32xbf16>
    tpu.vector_store %arg9[%c0_17, %c0_18], %18 {strides = array<i32>} : memref<16x32xbf16, #tpu.memory_space<vmem>>, vector<16x32xbf16>,
    %20 = arith.truncf %15 : vector<16x32xf32> to vector<16x32xbf16>
    %c0_19 = arith.constant 0 : index
    %c0_20 = arith.constant 0 : index
    %21 = vector.load %arg10[%c0_19, %c0_20] : memref<16x32xbf16, #tpu.memory_space<vmem>>, vector<16x32xbf16>
    tpu.vector_store %arg10[%c0_19, %c0_20], %20 {strides = array<i32>} : memref<16x32xbf16, #tpu.memory_space<vmem>>, vector<16x32xbf16>,
    return
  }
  func.func @transform_0(%arg0: i32) -> (i32, i32) {
    %c0_i32 = arith.constant 0 : i32
    %c0_i32_0 = arith.constant 0 : i32
    return %arg0, %c0_i32 : i32, i32
  }
  func.func @transform_1(%arg0: i32) -> (i32, i32) {
    %c0_i32 = arith.constant 0 : i32
    %c0_i32_0 = arith.constant 0 : i32
    %c0_i32_1 = arith.constant 0 : i32
    return %c0_i32, %c0_i32_0 : i32, i32
  }
  func.func @transform_2(%arg0: i32) -> (i32, i32) {
    %c0_i32 = arith.constant 0 : i32
    %c0_i32_0 = arith.constant 0 : i32
    %c0_i32_1 = arith.constant 0 : i32
    return %c0_i32, %c0_i32_0 : i32, i32
  }
  func.func @transform_3(%arg0: i32) -> (i32, i32) {
    %c0_i32 = arith.constant 0 : i32
    %c0_i32_0 = arith.constant 0 : i32
    %c0_i32_1 = arith.constant 0 : i32
    return %c0_i32, %c0_i32_0 : i32, i32
  }
  func.func @transform_4(%arg0: i32) -> (i32, i32) {
    %c0_i32 = arith.constant 0 : i32
    %c0_i32_0 = arith.constant 0 : i32
    %c0_i32_1 = arith.constant 0 : i32
    return %c0_i32, %c0_i32_0 : i32, i32
  }
  func.func @transform_5(%arg0: i32) -> (i32, i32) {
    %c0_i32 = arith.constant 0 : i32
    %c0_i32_0 = arith.constant 0 : i32
    %c0_i32_1 = arith.constant 0 : i32
    return %c0_i32, %c0_i32_0 : i32, i32
  }
  func.func @transform_6(%arg0: i32) -> (i32, i32) {
    %c0_i32 = arith.constant 0 : i32
    %c0_i32_0 = arith.constant 0 : i32
    %c0_i32_1 = arith.constant 0 : i32
    return %c0_i32, %c0_i32_0 : i32, i32
  }
  func.func @transform_7(%arg0: i32) -> (i32, i32) {
    %c0_i32 = arith.constant 0 : i32
    %c0_i32_0 = arith.constant 0 : i32
    return %arg0, %c0_i32 : i32, i32
  }
  func.func @transform_8(%arg0: i32) -> (i32, i32) {
    %c0_i32 = arith.constant 0 : i32
    %c0_i32_0 = arith.constant 0 : i32
    return %arg0, %c0_i32 : i32, i32
  }
  func.func @transform_9(%arg0: i32) -> (i32, i32) {
    %c0_i32 = arith.constant 0 : i32
    %c0_i32_0 = arith.constant 0 : i32
    return %arg0, %c0_i32 : i32, i32
  }
}

</mosaic_0001>

<bundles_post_ra>
// kernel: tpu_custom_call.1
= control target key start
LH: loop header
LB: loop body
LE: loop exit
PB: predicated region body
PF: predicated region fallthrough
CT: control target
= control target key end

     0   :  { %15 = vsyncpa [#allocation3], 0  ;;  %s718_s0 = inlined_call_operand.hbm [shape: bf16[16,32], index: 0, kind: input, shape index: {}]   ;;  %s719_s1 = inlined_call_operand.hbm [shape: bf16[32,32], index: 1, kind: input, shape index: {}]   ;;  %s720_s2 = inlined_call_operand.hbm [shape: bf16[32,32], index: 2, kind: input, shape index: {}]   ;;  %s721_s3 = inlined_call_operand.hbm [shape: bf16[32,32], index: 3, kind: input, shape index: {}]   ;;  %s722_s4 = inlined_call_operand.vmem [shape: f32[1,32], index: 4, kind: input, shape index: {}]   ;;  %s723_s5 = inlined_call_operand.vmem [shape: f32[1,32], index: 5, kind: input, shape index: {}]   ;;  %s724_s6 = inlined_call_operand.vmem [shape: f32[1,32], index: 6, kind: input, shape index: {}]   ;;  %s725_s7 = inlined_call_operand.hbm [shape: bf16[16,32], index: 7, kind: output, shape index: {0}]   ;;  %s726_s8 = inlined_call_operand.hbm [shape: bf16[16,32], index: 8, kind: output, shape index: {1}]   ;;  %s727_s9 = inlined_call_operand.hbm [shape: bf16[16,32], index: 9, kind: output, shape index: {2}]  }
   0x1   :  { %16 = vsyncpa [#allocation6], 0 }
   0x2   :  { %17 = vsyncpa [#allocation9], 0 }
   0x3   :  { %18 = vsyncpa [#allocation4], 0 }
   0x4   :  { %19 = vsyncpa [#allocation12], 0  ;;  %s597_s30 = smov [#allocation5]   ;;  %s598_s11 = smov [#allocation2]  }
   0x5   :  { %s37_s10 = sshll.u32 %s597_s30, 4  ;;  %s25_s12 = sshll.u32 %s598_s11, 4  ;;  %s38_s10 = int_to_ptr.vmem [resolvable:$true] %s37_s10  ;;  %s26_s12 = int_to_ptr.vmem [resolvable:$true] %s25_s12 }
   0x6   :  { %s455_s13 = scalar_lea.vmem %s38_s10, 256  ;;  %p460_p1 = scmp.lt.s32.totalorder %s38_s10, %s38_s10 }
   0x7   :  { %p456_p0 = scmp.ne.s32.totalorder %s38_s10, %s455_s13  ;;  %p461_p2 = scmp.lt.s32.totalorder %s455_s13, %s455_s13 }
   0x9   :  { %p462_p3 = por %p461_p2, %p460_p1 }
   0xb   :  { %p463_p4 = pnand %p462_p3, %p456_p0 }
   0xd   :  { %466 = shalt.err (!%p463_p4)
}
   0xe   :  { %s599_s14 = smov 64   ;;  %s600_s15 = smov 4  }
   0xf   :  { %43 = dma.hbm_to_vmem [thread:$0]  %s719_s1, 256, %s38_s10, [#allocation6], %s599_s14, %s599_s14, %s600_s15  }
  0x10   :  { %s475_s18 = scalar_lea.vmem %s26_s12, 128  ;;  %p480_p6 = scmp.lt.s32.totalorder %s26_s12, %s26_s12 }
  0x11   :  { %p476_p5 = scmp.ne.s32.totalorder %s26_s12, %s475_s18  ;;  %p481_p7 = scmp.lt.s32.totalorder %s475_s18, %s475_s18 }
  0x13   :  { %p482_p8 = por %p481_p7, %p480_p6 }
  0x15   :  { %p483_p9 = pnand %p482_p8, %p476_p5 }
  0x17   :  { %486 = shalt.err (!%p483_p9)
}
  0x18   :  { %31 = dma.hbm_to_vmem [thread:$0]  %s718_s0, 128, %s26_s12, [#allocation3], %s599_s14, %s599_s14, %s600_s15  }
  0x19   :  { %s601_s21 = smov [#allocation7]   ;;  %s602_s23 = smov [#allocation8]  }
  0x1a   :  { %s49_s22 = sshll.u32 %s601_s21, 4  ;;  %s61_s24 = sshll.u32 %s602_s23, 4  ;;  %s50_s22 = int_to_ptr.vmem [resolvable:$true] %s49_s22  ;;  %s62_s24 = int_to_ptr.vmem [resolvable:$true] %s61_s24 }
  0x1b   :  { %s495_s1 = scalar_lea.vmem %s50_s22, 256  ;;  %p500_p11 = scmp.lt.s32.totalorder %s50_s22, %s50_s22 }
  0x1c   :  { %p496_p10 = scmp.ne.s32.totalorder %s50_s22, %s495_s1  ;;  %p501_p12 = scmp.lt.s32.totalorder %s495_s1, %s495_s1 }
  0x1e   :  { %p502_p13 = por %p501_p12, %p500_p11 }
  0x20   :  { %p503_p0 = pnand %p502_p13, %p496_p10 }
  0x22   :  { %506 = shalt.err (!%p503_p0)
}
  0x23   :  { %55 = dma.hbm_to_vmem [thread:$0]  %s720_s2, 256, %s50_s22, [#allocation6], %s599_s14, %s599_s14, %s600_s15  }
  0x24   :  { %s515_s0 = scalar_lea.vmem %s62_s24, 256  ;;  %p520_p2 = scmp.lt.s32.totalorder %s62_s24, %s62_s24 }
  0x25   :  { %p516_p1 = scmp.ne.s32.totalorder %s62_s24, %s515_s0  ;;  %p521_p3 = scmp.lt.s32.totalorder %s515_s0, %s515_s0 }
  0x27   :  { %p522_p4 = por %p521_p3, %p520_p2 }
  0x29   :  { %p523_p5 = pnand %p522_p4, %p516_p1 }
  0x2b   :  { %526 = shalt.err (!%p523_p5)
}
  0x2c   :  { %67 = dma.hbm_to_vmem [thread:$0]  %s721_s3, 256, %s62_s24, [#allocation9], %s599_s14, %s599_s14, %s600_s15  }
  0x2d   :  { %587 = dma.done.wait [#allocation3], 128  }
  0x2e   :  { %588 = vsyncadd [#allocation3], 4294967168 }
  0x2f   :  { %589 = dma.done.wait [#allocation6], 512  }
  0x30   :  { %590 = vsyncadd [#allocation6], 4294966784 }
  0x31   :  { %591 = dma.done.wait [#allocation9], 256  }
  0x32   :  { %592 = vsyncadd [#allocation9], 4294967040  ;;  %v603_v0 = vmov 0.0   ;;  %vm604_vm0 = vmmov 0   ;;  %v440_v1 = vld [vmem:[#allocation5 + $0x8] sm:$0xff]   ;;  %v441_v2 = vld [vmem:[#allocation7 + $0x8] sm:$0xff]  }
  0x33   :  { %405 = vmatprep.subr.bf16.mxu0 %v603_v0  ;;  %413 = vmatprep.subr.bf16.mxu1 %v603_v0  ;;  %v442_v3 = vld [vmem:[#allocation5] sm:$0xff]   ;;  %v443_v4 = vld [vmem:[#allocation7] sm:$0xff]   ;;  %v444_v5 = vld [vmem:[#allocation2] sm:$0xff]   ;;  %vm117_vm1 = vcmask 261120   ;;  %vm298_vm2 = vcmask 257024   ;;  %s605_s10 = smov [#allocation10]  }
  0x34   :  { %409 = vmatprep.mubr.msk.bf16.mxu0 %vm604_vm0, %v603_v0  ;;  %417 = vmatprep.mubr.msk.bf16.mxu1 %vm604_vm0, %v603_v0  ;;  %v445_v6 = vld [vmem:[#allocation8 + $0x8] sm:$0xff]   ;;  %v446_v7 = vld [vmem:[#allocation8] sm:$0xff]   ;;  %v371_v8 = vld [vmem:[%s722_s4] ss:$0 sm:$0xff]  ;;  %s326_s11 = sshll.u32 %s605_s10, 4  ;;  %s606_s4 = smov [#allocation11]   ;;  %s327_s11 = int_to_ptr.vmem [resolvable:$true] %s326_s11 }
  0x35   :  { %406 = vmatpush3.bf16.msra.mxu0 %v440_v1  ;;  %414 = vmatpush3.bf16.msra.mxu1 %v441_v2  ;;  %v376_v9 = vld [vmem:[%s723_s5] ss:$0 sm:$0xff]  ;;  %s338_s12 = sshll.u32 %s606_s4, 4  ;;  %s527_s16 = scalar_lea.vmem %s327_s11, 128  ;;  %s339_s12 = int_to_ptr.vmem [resolvable:$true] %s338_s12 }
  0x36   :  { %407 = vmatprep.subr.bf16.mxu0 %v603_v0  ;;  %415 = vmatprep.subr.bf16.mxu1 %v603_v0  ;;  %v380_v23 = vld [vmem:[%s724_s6] ss:$0 sm:$0xff]  ;;  %p528_p6 = scmp.ne.s32.totalorder %s327_s11, %s527_s16  ;;  %p532_p7 = scmp.lt.s32.totalorder %s327_s11, %s327_s11 }
  0x37   :  { %p533_p8 = scmp.lt.s32.totalorder %s527_s16, %s527_s16 }
  0x39   :  { %408 = vmatpush3.bf16.msra.mxu0 %v442_v3  ;;  %416 = vmatpush3.bf16.msra.mxu1 %v443_v4  ;;  %p534_p9 = por %p533_p8, %p532_p7 }
  0x3a   :  { %421 = vmatprep.subr.bf16.mxu0 %v603_v0 }
  0x3b   :  { %p535_p10 = pnand %p534_p9, %p528_p6 }
  0x3c   :  { %410 = vmatmul.mubr.msk.bf16.vlgmr.msra.gmra.mxu0 %vm117_vm1, %v444_v5  ;;  %418 = vmatmul.mubr.msk.bf16.vlgmr.msra.gmra.mxu1 %vm117_vm1, %v444_v5 }
  0x3d   :  { %422 = vmatpush3.bf16.msra.mxu0 %v445_v6  ;;  %425 = vmatprep.mubr.msk.bf16.mxu0 %vm604_vm0, %v603_v0 }
  0x3e   :  { %423 = vmatprep.subr.bf16.mxu0 %v603_v0 }
  0x41   :  { %424 = vmatpush3.bf16.msra.mxu0 %v446_v7 }
  0x44   :  { %426 = vmatmul.mubr.msk.bf16.vlgmr.msra.gmra.mxu0 %vm117_vm1, %v444_v5 }
  0xfc   :  { %v155_v10 = vpop.f32.mrf.mxu0  ;;  %v219_v12 = vpop.f32.mrf.mxu1 }
  0xfd   :  { %v156_v11 = vadd.f32 %v371_v8, %v155_v10  ;;  %v220_v14 = vadd.f32 %v376_v9, %v219_v12 }
  0xfe   :  { %v411_v13 = vpop.f32.mrf.mxu0  ;;  %v419_v16 = vpop.f32.mrf.mxu1 }
  0xff   :  { %v390_v15 = vpack.c.bf16 %v156_v11, %v156_v11  ;;  %v392_v17 = vpack.c.bf16 %v220_v14, %v220_v14 }
 0x100   :  { %v158_v18 = vpop.f32.mrf.mxu0  ;;  %v222_v20 = vpop.f32.mrf.mxu1 }
 0x101   :  { %v159_v19 = vadd.f32 %v371_v8, %v158_v18  ;;  %299 = vst.msk [vmem:[#allocation10] sm:$0xf] %vm298_vm2, %v390_v15  ;;  %v223_v22 = vadd.f32 %v376_v9, %v222_v20  ;;  %309 = vst.msk [vmem:[#allocation11] sm:$0xf] %vm298_vm2, %v392_v17 }
 0x102   :  { %v412_v21 = vpop.f32.mrf.mxu0  ;;  %v420_v25 = vpop.f32.mrf.mxu1 }
 0x103   :  { %v391_v24 = vpack.c.bf16 %v159_v19, %v159_v19  ;;  %v393_v26 = vpack.c.bf16 %v223_v22, %v223_v22 }
 0x104   :  { %v283_v27 = vpop.f32.mrf.mxu0 }
 0x105   :  { %v284_v28 = vadd.f32 %v380_v23, %v283_v27  ;;  %300 = vst.msk [vmem:[#allocation10 + $0x4] sm:$0xf] %vm298_vm2, %v391_v24  ;;  %310 = vst.msk [vmem:[#allocation11 + $0x4] sm:$0xf] %vm298_vm2, %v393_v26 }
 0x106   :  { %v427_v29 = vpop.f32.mrf.mxu0 }
 0x107   :  { %538 = shalt.err (!%p535_p10)
}
 0x108   :  { %332 = dma.vmem_to_hbm [thread:$0]  %s327_s11, 128, %s725_s7, [#allocation4], %s599_s14, %s599_s14, %s600_s15   ;;  %v394_v30 = vpack.c.bf16 %v284_v28, %v284_v28 }
 0x109   :  { %s547_s18 = scalar_lea.vmem %s339_s12, 128  ;;  %p552_p12 = scmp.lt.s32.totalorder %s339_s12, %s339_s12 }
 0x10a   :  { %p548_p11 = scmp.ne.s32.totalorder %s339_s12, %s547_s18  ;;  %p553_p13 = scmp.lt.s32.totalorder %s547_s18, %s547_s18 }
 0x10c   :  { %p554_p0 = por %p553_p13, %p552_p12 }
 0x10e   :  { %p555_p1 = pnand %p554_p0, %p548_p11 }
 0x110   :  { %558 = shalt.err (!%p555_p1)
}
 0x111   :  { %344 = dma.vmem_to_hbm [thread:$0]  %s339_s12, 128, %s726_s8, [#allocation12], %s599_s14, %s599_s14, %s600_s15   ;;  %v286_v31 = vpop.f32.mrf.mxu0  ;;  %319 = vst.msk [vmem:[#allocation13] sm:$0xf] %vm298_vm2, %v394_v30 }
 0x112   :  { %s607_s21 = smov [#allocation13]   ;;  %v287_v32 = vadd.f32 %v380_v23, %v286_v31 }
 0x113   :  { %s350_s22 = sshll.u32 %s607_s21, 4  ;;  %v428_v33 = vpop.f32.mrf.mxu0  ;;  %s351_s22 = int_to_ptr.vmem [resolvable:$true] %s350_s22 }
 0x114   :  { %v395_v34 = vpack.c.bf16 %v287_v32, %v287_v32  ;;  %s567_s7 = scalar_lea.vmem %s351_s22, 128  ;;  %p572_p3 = scmp.lt.s32.totalorder %s351_s22, %s351_s22 }
 0x115   :  { %p568_p2 = scmp.ne.s32.totalorder %s351_s22, %s567_s7  ;;  %p573_p4 = scmp.lt.s32.totalorder %s567_s7, %s567_s7 }
 0x116   :  { %320 = vst.msk [vmem:[#allocation13 + $0x4] sm:$0xf] %vm298_vm2, %v395_v34 }
 0x117   :  { %p574_p5 = por %p573_p4, %p572_p3 }
 0x119   :  { %p575_p6 = pnand %p574_p5, %p568_p2 }
 0x11b   :  { %578 = shalt.err (!%p575_p6)
}
 0x11c   :  { %356 = dma.vmem_to_hbm [thread:$0]  %s351_s22, 128, %s727_s9, [#allocation12], %s599_s14, %s599_s14, %s600_s15  }
 0x11d   :  { %593 = dma.done.wait [#allocation4], 128  }
 0x11e   :  { %594 = vsyncadd [#allocation4], 4294967168 }
 0x11f   :  { %595 = dma.done.wait [#allocation12], 256  }
 0x120   :  { %596 = vsyncadd [#allocation12], 4294967040 }
 0x121   :  { %366 = vsyncpa [#allocation3], 1 }
 0x122   :  { %367 = vsyncpa [#allocation6], 1 }
 0x123   :  { %368 = vsyncpa [#allocation9], 1 }
 0x124   :  { %369 = vsyncpa [#allocation4], 1 }
 0x125   :  { %370 = vsyncpa [#allocation12], 1 }

</bundles_post_ra>
